<compile_context>
chip_gen: v7x
topology: tpu7x:2x2x1
jax: 0.10.0
libtpu: 0.0.40
codegen_flags: <defaults>
</compile_context>

<pallas_src>
import jax
import jax.numpy as jnp
import numpy as np
from jax.experimental import pallas as pl
from jax.experimental.pallas import tpu as pltpu

_LANE = 128


def _round_up(x, m):
    return ((x + m - 1) // m) * m


# ----------------------------------------------------------------------------
# Fused kernel: multi-hot embedding matmul + (Linear -> ReLU)* -> Linear (all BN folded)
# ----------------------------------------------------------------------------
def _make_kernel(n_cat, n_extra_hidden):
    """Ref layout:
         g_ref   (bt, n_cat)      int32  global one-hot column index per categorical col
         xc_ref  (bt, n_cont)     f32    raw continuous features (bn_cont folded into weights)
         a_ref   (n_onehot, h1)   cdt    blockdiag(emb tables) @ W1[:total_emb]
         bc_ref  (n_cont, h1)     cdt    diag(bn_cont scale) @ W1[total_emb:]
         b1_ref  (1, h1)          f32    folded bias of layer 1
         (w_ref, b_ref) * n_extra_hidden        (previous layer's BN folded in)
         wo_ref  (h_last, 128)    cdt    output weights (last BN folded, zero-padded to 128)
         bo_ref  (1, 128)         f32
         out_ref (bt, 128)        f32
    """
    def kernel(*refs):
        g_ref, xc_ref, a_ref, bc_ref, b1_ref = refs[:5]
        idx = 5

        bt = g_ref.shape[0]
        n_onehot = a_ref.shape[0]
        cdt = a_ref.dtype  # matmul compute dtype (bf16 or f32)

        # Multi-hot selector over all categorical columns (one 1 per column block).
        # Pure VPU compares + adds on a (bt, n_onehot) tile — no gather, no DMA.
        g = g_ref[...]
        lane = jax.lax.broadcasted_iota(jnp.int32, (bt, n_onehot), 1)
        onehot = jnp.zeros((bt, n_onehot), cdt)
        for c in range(n_cat):
            onehot = onehot + (lane == g[:, c:c + 1]).astype(cdt)

        # Layer 1: embedding path (onehot @ folded tables) + continuous path (bn_cont folded).
        z = jnp.dot(onehot, a_ref[...], preferred_element_type=jnp.float32)
        z = z + jnp.dot(xc_ref[...].astype(cdt), bc_ref[...],
                        preferred_element_type=jnp.float32)
        z = z + b1_ref[...]
        h = jnp.maximum(z, 0.0)  # ReLU; BN folded into next layer, Dropout = identity

        for _ in range(n_extra_hidden):
            w_ref, b_ref = refs[idx], refs[idx + 1]
            idx += 2
            z = jnp.dot(h.astype(cdt), w_ref[...],
                        preferred_element_type=jnp.float32) + b_ref[...]
            h = jnp.maximum(z, 0.0)

        wo_ref, bo_ref, out_ref = refs[idx], refs[idx + 1], refs[idx + 2]
        out_ref[...] = (jnp.dot(h.astype(cdt), wo_ref[...],
                                preferred_element_type=jnp.float32) + bo_ref[...])

    return kernel


def tabular_mlp_pallas(folded, g_idx, x_cont, *, batch_tile=256):
    """g_idx: (B, n_cat) int32 global one-hot indices; x_cont: (B, n_cont) f32."""
    B, n_cat = g_idx.shape
    n_cont = x_cont.shape[1]
    out_pad = folded["out_w"].shape[1]  # already padded to a multiple of 128
    n_extra = len(folded["hidden"])

    # Batch tile: multiple of 16 (bf16 sublane packing), no larger than the padded batch.
    bt = min(batch_tile, _round_up(B, 16))
    bt = _round_up(bt, 16)
    Bp = _round_up(B, bt)
    if Bp != B:
        g_idx = jnp.pad(g_idx, ((0, Bp - B), (0, 0)))
        x_cont = jnp.pad(x_cont, ((0, Bp - B), (0, 0)))

    operands = [g_idx, x_cont, folded["A"], folded["Bc"], folded["b1"]]
    in_specs = [
        pl.BlockSpec((bt, n_cat), lambda i: (i, 0)),      # indices: tiled over batch
        pl.BlockSpec((bt, n_cont), lambda i: (i, 0)),     # continuous: tiled over batch
        pl.BlockSpec(folded["A"].shape, lambda i: (0, 0)),
        pl.BlockSpec(folded["Bc"].shape, lambda i: (0, 0)),
        pl.BlockSpec(folded["b1"].shape, lambda i: (0, 0)),
    ]
    for (w, b) in folded["hidden"]:
        operands += [w, b]
        in_specs += [pl.BlockSpec(w.shape, lambda i: (0, 0)),
                     pl.BlockSpec(b.shape, lambda i: (0, 0))]
    operands += [folded["out_w"], folded["out_b"]]
    in_specs += [pl.BlockSpec(folded["out_w"].shape, lambda i: (0, 0)),
                 pl.BlockSpec(folded["out_b"].shape, lambda i: (0, 0))]

    return pl.pallas_call(
        _make_kernel(n_cat, n_extra),
        out_shape=jax.ShapeDtypeStruct((Bp, out_pad), jnp.float32),
        grid=(Bp // bt,),
        in_specs=in_specs,
        out_specs=pl.BlockSpec((bt, out_pad), lambda i: (i, 0)),  # lane-dense stores
        compiler_params=pltpu.CompilerParams(dimension_semantics=("parallel",)),
    )(*operands)


def tabular_model_forward(folded, x_cat, x_cont, *, batch_tile=256):
    g = x_cat.astype(jnp.int32) + folded["cat_offsets"][None, :]
    out = tabular_mlp_pallas(folded, g, x_cont.astype(jnp.float32), batch_tile=batch_tile)
    return out[: x_cat.shape[0], : folded["out_sz"]]


# ----------------------------------------------------------------------------
# "PyTorch-equivalent" raw parameters, offline folding, and a pure-JAX reference
# ----------------------------------------------------------------------------
def init_raw_params(key, emb_sizes, n_cont, out_sz, layers):
    keys = iter(jax.random.split(key, 128))
    emb_tables = [0.1 * jax.random.normal(next(keys), (ni, nf), jnp.float32)
                  for ni, nf in emb_sizes]
    bn_cont = dict(
        gamma=1.0 + 0.1 * jax.random.normal(next(keys), (n_cont,), jnp.float32),
        beta=0.1 * jax.random.normal(next(keys), (n_cont,), jnp.float32),
        mean=0.1 * jax.random.normal(next(keys), (n_cont,), jnp.float32),
        var=jnp.abs(1.0 + 0.1 * jax.random.normal(next(keys), (n_cont,), jnp.float32)),
    )
    total_emb = sum(nf for _, nf in emb_sizes)
    d = total_emb + n_cont
    hidden = []
    for h in layers:
        hidden.append(dict(
            w=0.1 * jax.random.normal(next(keys), (d, h), jnp.float32),
            b=0.1 * jax.random.normal(next(keys), (h,), jnp.float32),
            gamma=1.0 + 0.1 * jax.random.normal(next(keys), (h,), jnp.float32),
            beta=0.1 * jax.random.normal(next(keys), (h,), jnp.float32),
            mean=0.1 * jax.random.normal(next(keys), (h,), jnp.float32),
            var=jnp.abs(1.0 + 0.1 * jax.random.normal(next(keys), (h,), jnp.float32)),
        ))
        d = h
    out_w = 0.1 * jax.random.normal(next(keys), (d, out_sz), jnp.float32)
    out_b = 0.1 * jax.random.normal(next(keys), (out_sz,), jnp.float32)
    return dict(emb_sizes=emb_sizes, emb_tables=emb_tables, bn_cont=bn_cont,
                hidden=hidden, out_w=out_w, out_b=out_b)


def fold_params(raw, *, compute_dtype=jnp.bfloat16, eps=1e-5):
    """Fold embeddings + every eval-mode BN into adjacent Linear weights (exact algebra)."""
    emb_sizes = raw["emb_sizes"]
    total_emb = sum(nf for _, nf in emb_sizes)

    W1 = raw["hidden"][0]["w"]
    b1 = raw["hidden"][0]["b"]

    # (a) embedding tables folded through their row-slices of W1 (one-hot path).
    A_blocks, f_off = [], 0
    for tbl, (ni, nf) in zip(raw["emb_tables"], emb_sizes):
        A_blocks.append(tbl @ W1[f_off:f_off + nf, :])
        f_off += nf
    A = jnp.concatenate(A_blocks, axis=0)  # (sum_ni, h1)

    # (b) eval-mode bn_cont folded into the continuous rows of W1 / bias.
    bc = raw["bn_cont"]
    sc = bc["gamma"] / jnp.sqrt(bc["var"] + eps)
    sh = bc["beta"] - bc["mean"] * sc
    W1c = W1[total_emb:, :]
    Bc = sc[:, None] * W1c
    b1f = b1 + sh @ W1c

    # (c) each hidden BN folded into the NEXT Linear layer.
    def bn_scale_shift(layer):
        s = layer["gamma"] / jnp.sqrt(layer["var"] + eps)
        t = layer["beta"] - layer["mean"] * s
        return s, t

    hidden_ops = []
    prev_s, prev_t = bn_scale_shift(raw["hidden"][0])
    for layer in raw["hidden"][1:]:
        w = prev_s[:, None] * layer["w"]
        b = layer["b"] + prev_t @ layer["w"]
        hidden_ops.append((w.astype(compute_dtype),
                           b.reshape(1, -1).astype(jnp.float32)))
        prev_s, prev_t = bn_scale_shift(layer)

    # (d) last BN folded into the output Linear; zero-pad output width to 128 lanes.
    ow = prev_s[:, None] * raw["out_w"]
    ob = raw["out_b"] + prev_t @ raw["out_w"]
    out_sz = ow.shape[1]
    out_pad = _round_up(out_sz, _LANE)
    ow = jnp.pad(ow, ((0, 0), (0, out_pad - out_sz)))
    ob = jnp.pad(ob, ((0, out_pad - out_sz),))

    cat_offsets = np.cumsum([0] + [ni for ni, _ in emb_sizes[:-1]]).astype(np.int32)

    return dict(
        A=A.astype(compute_dtype),
        Bc=Bc.astype(compute_dtype),
        b1=b1f.reshape(1, -1).astype(jnp.float32),
        hidden=hidden_ops,
        out_w=ow.astype(compute_dtype),
        out_b=ob.reshape(1, -1).astype(jnp.float32),
        cat_offsets=jnp.asarray(cat_offsets, dtype=jnp.int32),
        out_sz=out_sz,
    )


def reference_forward(raw, x_cat, x_cont, eps=1e-5):
    """Pure-JAX f32 mirror of the PyTorch module in eval mode (Dropout = identity)."""
    embs = [tbl[x_cat[:, i]] for i, tbl in enumerate(raw["emb_tables"])]
    x_emb = jnp.concatenate(embs, axis=1)
    bc = raw["bn_cont"]
    xc = (x_cont - bc["mean"]) / jnp.sqrt(bc["var"] + eps) * bc["gamma"] + bc["beta"]
    x = jnp.concatenate([x_emb, xc], axis=1)
    for layer in raw["hidden"]:
        x = x @ layer["w"] + layer["b"]
        x = jnp.maximum(x, 0.0)
        x = (x - layer["mean"]) / jnp.sqrt(layer["var"] + eps) * layer["gamma"] + layer["beta"]
    return x @ raw["out_w"] + raw["out_b"]


# ----------------------------------------------------------------------------
if __name__ == "__main__":
    # emb_sizes as the script derives them: (n_categories, min(50, (nunique+1)//2))
    # for cat_cols = [homeowner, female, zipconvert, wealth, income, num_child].
    emb_sizes = [(2, 1), (2, 1), (5, 3), (9, 5), (7, 4), (5, 3)]
    n_cont = 4
    out_sz = 2
    layers = [32, 16]

    key = jax.random.PRNGKey(0)
    k_params, k_cat, k_cont = jax.random.split(key, 3)
    raw = init_raw_params(k_params, emb_sizes, n_cont, out_sz, layers)

    B = 16
    cat_keys = jax.random.split(k_cat, len(emb_sizes))
    x_cat = jnp.stack(
        [jax.random.randint(cat_keys[i], (B,), 0, ni, dtype=jnp.int32)
         for i, (ni, _) in enumerate(emb_sizes)],
        axis=1,
    )  # (B, 6) int32
    x_cont = jax.random.normal(k_cont, (B, n_cont), jnp.float32)  # (B, 4)

    ref = reference_forward(raw, x_cat, x_cont)

    # Strict check of the fused kernel / folding with f32 matmuls.
    folded_f32 = fold_params(raw, compute_dtype=jnp.float32)
    out_f32 = jax.block_until_ready(tabular_model_forward(folded_f32, x_cat, x_cont))
    assert out_f32.shape == (B, out_sz) and out_f32.dtype == jnp.float32
    err_f32 = float(jnp.max(jnp.abs(out_f32 - ref)))
    assert err_f32 < 1e-3, f"f32 kernel mismatch: max abs err {err_f32}"

    # Shipped configuration: bf16 MXU inputs, f32 accumulation (small expected drift).
    folded_bf16 = fold_params(raw, compute_dtype=jnp.bfloat16)
    out_bf16 = jax.block_until_ready(tabular_model_forward(folded_bf16, x_cat, x_cont))
    assert out_bf16.shape == (B, out_sz) and out_bf16.dtype == jnp.float32
    err_bf16 = float(jnp.max(jnp.abs(out_bf16 - ref)))
    assert err_bf16 < 5e-2, f"bf16 kernel drift too large: max abs err {err_bf16}"

    print("KERNEL_OK")
</pallas_src>

<mosaic_0001>
module attributes {stable_mosaic.version = 11 : i64} {
  func.func @kernel(%arg0: i32, %arg1: memref<16x6xi32, #tpu.memory_space<vmem>>, %arg2: memref<16x4xf32, #tpu.memory_space<vmem>>, %arg3: memref<30x32xf32, #tpu.memory_space<vmem>>, %arg4: memref<4x32xf32, #tpu.memory_space<vmem>>, %arg5: memref<1x32xf32, #tpu.memory_space<vmem>>, %arg6: memref<32x16xf32, #tpu.memory_space<vmem>>, %arg7: memref<1x16xf32, #tpu.memory_space<vmem>>, %arg8: memref<16x128xf32, #tpu.memory_space<vmem>>, %arg9: memref<1x128xf32, #tpu.memory_space<vmem>>, %arg10: memref<16x128xf32, #tpu.memory_space<vmem>>) attributes {dimension_semantics = [#tpu.dimension_semantics<parallel>], iteration_bounds = array<i64: 1>, scalar_prefetch = 0 : i64, scratch_operands = 0 : i64, tpu.core_type = #tpu.core_type<tc>, window_params = [{transform_indices = @transform_0, window_bounds = array<i64: 16, 6>}, {transform_indices = @transform_1, window_bounds = array<i64: 16, 4>}, {pipeline_mode = #tpu.pipeline_mode<synchronous>, transform_indices = @transform_2, window_bounds = array<i64: 30, 32>}, {pipeline_mode = #tpu.pipeline_mode<synchronous>, transform_indices = @transform_3, window_bounds = array<i64: 4, 32>}, {pipeline_mode = #tpu.pipeline_mode<synchronous>, transform_indices = @transform_4, window_bounds = array<i64: 1, 32>}, {pipeline_mode = #tpu.pipeline_mode<synchronous>, transform_indices = @transform_5, window_bounds = array<i64: 32, 16>}, {pipeline_mode = #tpu.pipeline_mode<synchronous>, transform_indices = @transform_6, window_bounds = array<i64: 1, 16>}, {pipeline_mode = #tpu.pipeline_mode<synchronous>, transform_indices = @transform_7, window_bounds = array<i64: 16, 128>}, {pipeline_mode = #tpu.pipeline_mode<synchronous>, transform_indices = @transform_8, window_bounds = array<i64: 1, 128>}, {transform_indices = @transform_9, window_bounds = array<i64: 16, 128>}]} {
    %c0 = arith.constant 0 : index
    %c0_0 = arith.constant 0 : index
    %0 = vector.load %arg1[%c0, %c0_0] : memref<16x6xi32, #tpu.memory_space<vmem>>, vector<16x6xi32>
    %1 = tpu.iota {dimensions = array<i32: 1>} : vector<16x30xi32>
    %cst = arith.constant 0.000000e+00 : f32
    %2 = vector.broadcast %cst : f32 to vector<16x30xf32>
    %3 = vector.extract_strided_slice %0 {offsets = [0, 0], sizes = [16, 1], strides = [1, 1]} : vector<16x6xi32> to vector<16x1xi32>
    %4 = vector.broadcast %3 : vector<16x1xi32> to vector<16x30xi32>
    %5 = arith.cmpi eq, %1, %4 : vector<16x30xi32>
    %6 = arith.extui %5 : vector<16x30xi1> to vector<16x30xi32>
    %7 = arith.sitofp %6 : vector<16x30xi32> to vector<16x30xf32>
    %8 = arith.addf %2, %7 : vector<16x30xf32>
    %9 = vector.extract_strided_slice %0 {offsets = [0, 1], sizes = [16, 1], strides = [1, 1]} : vector<16x6xi32> to vector<16x1xi32>
    %10 = vector.broadcast %9 : vector<16x1xi32> to vector<16x30xi32>
    %11 = arith.cmpi eq, %1, %10 : vector<16x30xi32>
    %12 = arith.extui %11 : vector<16x30xi1> to vector<16x30xi32>
    %13 = arith.sitofp %12 : vector<16x30xi32> to vector<16x30xf32>
    %14 = arith.addf %8, %13 : vector<16x30xf32>
    %15 = vector.extract_strided_slice %0 {offsets = [0, 2], sizes = [16, 1], strides = [1, 1]} : vector<16x6xi32> to vector<16x1xi32>
    %16 = vector.broadcast %15 : vector<16x1xi32> to vector<16x30xi32>
    %17 = arith.cmpi eq, %1, %16 : vector<16x30xi32>
    %18 = arith.extui %17 : vector<16x30xi1> to vector<16x30xi32>
    %19 = arith.sitofp %18 : vector<16x30xi32> to vector<16x30xf32>
    %20 = arith.addf %14, %19 : vector<16x30xf32>
    %21 = vector.extract_strided_slice %0 {offsets = [0, 3], sizes = [16, 1], strides = [1, 1]} : vector<16x6xi32> to vector<16x1xi32>
    %22 = vector.broadcast %21 : vector<16x1xi32> to vector<16x30xi32>
    %23 = arith.cmpi eq, %1, %22 : vector<16x30xi32>
    %24 = arith.extui %23 : vector<16x30xi1> to vector<16x30xi32>
    %25 = arith.sitofp %24 : vector<16x30xi32> to vector<16x30xf32>
    %26 = arith.addf %20, %25 : vector<16x30xf32>
    %27 = vector.extract_strided_slice %0 {offsets = [0, 4], sizes = [16, 1], strides = [1, 1]} : vector<16x6xi32> to vector<16x1xi32>
    %28 = vector.broadcast %27 : vector<16x1xi32> to vector<16x30xi32>
    %29 = arith.cmpi eq, %1, %28 : vector<16x30xi32>
    %30 = arith.extui %29 : vector<16x30xi1> to vector<16x30xi32>
    %31 = arith.sitofp %30 : vector<16x30xi32> to vector<16x30xf32>
    %32 = arith.addf %26, %31 : vector<16x30xf32>
    %33 = vector.extract_strided_slice %0 {offsets = [0, 5], sizes = [16, 1], strides = [1, 1]} : vector<16x6xi32> to vector<16x1xi32>
    %34 = vector.broadcast %33 : vector<16x1xi32> to vector<16x30xi32>
    %35 = arith.cmpi eq, %1, %34 : vector<16x30xi32>
    %36 = arith.extui %35 : vector<16x30xi1> to vector<16x30xi32>
    %37 = arith.sitofp %36 : vector<16x30xi32> to vector<16x30xf32>
    %38 = arith.addf %32, %37 : vector<16x30xf32>
    %c0_1 = arith.constant 0 : index
    %c0_2 = arith.constant 0 : index
    %39 = vector.load %arg3[%c0_1, %c0_2] : memref<30x32xf32, #tpu.memory_space<vmem>>, vector<30x32xf32>
    %cst_3 = arith.constant dense<0.000000e+00> : vector<16x32xf32>
    %40 = tpu.matmul %38, %39, %cst_3 {dimension_numbers = #tpu.dot_dimension_numbers<[1], [0], [0], [1], [0, 0, 1, 1], [], []>} : vector<16x30xf32>, vector<30x32xf32>, vector<16x32xf32> -> vector<16x32xf32>
    %c0_4 = arith.constant 0 : index
    %c0_5 = arith.constant 0 : index
    %41 = vector.load %arg2[%c0_4, %c0_5] : memref<16x4xf32, #tpu.memory_space<vmem>>, vector<16x4xf32>
    %c0_6 = arith.constant 0 : index
    %c0_7 = arith.constant 0 : index
    %42 = vector.load %arg4[%c0_6, %c0_7] : memref<4x32xf32, #tpu.memory_space<vmem>>, vector<4x32xf32>
    %cst_8 = arith.constant dense<0.000000e+00> : vector<16x32xf32>
    %43 = tpu.matmul %41, %42, %cst_8 {dimension_numbers = #tpu.dot_dimension_numbers<[1], [0], [0], [1], [0, 0, 1, 1], [], []>} : vector<16x4xf32>, vector<4x32xf32>, vector<16x32xf32> -> vector<16x32xf32>
    %44 = arith.addf %40, %43 : vector<16x32xf32>
    %c0_9 = arith.constant 0 : index
    %c0_10 = arith.constant 0 : index
    %45 = vector.load %arg5[%c0_9, %c0_10] : memref<1x32xf32, #tpu.memory_space<vmem>>, vector<1x32xf32>
    %46 = vector.broadcast %45 : vector<1x32xf32> to vector<16x32xf32>
    %47 = arith.addf %44, %46 : vector<16x32xf32>
    %cst_11 = arith.constant 0.000000e+00 : f32
    %48 = vector.broadcast %cst_11 : f32 to vector<16x32xf32>
    %49 = arith.maximumf %47, %48 : vector<16x32xf32>
    %c0_12 = arith.constant 0 : index
    %c0_13 = arith.constant 0 : index
    %50 = vector.load %arg6[%c0_12, %c0_13] : memref<32x16xf32, #tpu.memory_space<vmem>>, vector<32x16xf32>
    %cst_14 = arith.constant dense<0.000000e+00> : vector<16x16xf32>
    %51 = tpu.matmul %49, %50, %cst_14 {dimension_numbers = #tpu.dot_dimension_numbers<[1], [0], [0], [1], [0, 0, 1, 1], [], []>} : vector<16x32xf32>, vector<32x16xf32>, vector<16x16xf32> -> vector<16x16xf32>
    %c0_15 = arith.constant 0 : index
    %c0_16 = arith.constant 0 : index
    %52 = vector.load %arg7[%c0_15, %c0_16] : memref<1x16xf32, #tpu.memory_space<vmem>>, vector<1x16xf32>
    %53 = vector.broadcast %52 : vector<1x16xf32> to vector<16x16xf32>
    %54 = arith.addf %51, %53 : vector<16x16xf32>
    %cst_17 = arith.constant 0.000000e+00 : f32
    %55 = vector.broadcast %cst_17 : f32 to vector<16x16xf32>
    %56 = arith.maximumf %54, %55 : vector<16x16xf32>
    %c0_18 = arith.constant 0 : index
    %c0_19 = arith.constant 0 : index
    %57 = vector.load %arg8[%c0_18, %c0_19] : memref<16x128xf32, #tpu.memory_space<vmem>>, vector<16x128xf32>
    %cst_20 = arith.constant dense<0.000000e+00> : vector<16x128xf32>
    %58 = tpu.matmul %56, %57, %cst_20 {dimension_numbers = #tpu.dot_dimension_numbers<[1], [0], [0], [1], [0, 0, 1, 1], [], []>} : vector<16x16xf32>, vector<16x128xf32>, vector<16x128xf32> -> vector<16x128xf32>
    %c0_21 = arith.constant 0 : index
    %c0_22 = arith.constant 0 : index
    %59 = vector.load %arg9[%c0_21, %c0_22] : memref<1x128xf32, #tpu.memory_space<vmem>>, vector<1x128xf32>
    %60 = vector.broadcast %59 : vector<1x128xf32> to vector<16x128xf32>
    %61 = arith.addf %58, %60 : vector<16x128xf32>
    %c0_23 = arith.constant 0 : index
    %c0_24 = arith.constant 0 : index
    %62 = vector.load %arg10[%c0_23, %c0_24] : memref<16x128xf32, #tpu.memory_space<vmem>>, vector<16x128xf32>
    tpu.vector_store %arg10[%c0_23, %c0_24], %61 {strides = array<i32>} : memref<16x128xf32, #tpu.memory_space<vmem>>, vector<16x128xf32>,
    return
  }
  func.func @transform_0(%arg0: i32) -> (i32, i32) {
    %c0_i32 = arith.constant 0 : i32
    %c0_i32_0 = arith.constant 0 : i32
    return %arg0, %c0_i32 : i32, i32
  }
  func.func @transform_1(%arg0: i32) -> (i32, i32) {
    %c0_i32 = arith.constant 0 : i32
    %c0_i32_0 = arith.constant 0 : i32
    return %arg0, %c0_i32 : i32, i32
  }
  func.func @transform_2(%arg0: i32) -> (i32, i32) {
    %c0_i32 = arith.constant 0 : i32
    %c0_i32_0 = arith.constant 0 : i32
    %c0_i32_1 = arith.constant 0 : i32
    return %c0_i32, %c0_i32_0 : i32, i32
  }
  func.func @transform_3(%arg0: i32) -> (i32, i32) {
    %c0_i32 = arith.constant 0 : i32
    %c0_i32_0 = arith.constant 0 : i32
    %c0_i32_1 = arith.constant 0 : i32
    return %c0_i32, %c0_i32_0 : i32, i32
  }
  func.func @transform_4(%arg0: i32) -> (i32, i32) {
    %c0_i32 = arith.constant 0 : i32
    %c0_i32_0 = arith.constant 0 : i32
    %c0_i32_1 = arith.constant 0 : i32
    return %c0_i32, %c0_i32_0 : i32, i32
  }
  func.func @transform_5(%arg0: i32) -> (i32, i32) {
    %c0_i32 = arith.constant 0 : i32
    %c0_i32_0 = arith.constant 0 : i32
    %c0_i32_1 = arith.constant 0 : i32
    return %c0_i32, %c0_i32_0 : i32, i32
  }
  func.func @transform_6(%arg0: i32) -> (i32, i32) {
    %c0_i32 = arith.constant 0 : i32
    %c0_i32_0 = arith.constant 0 : i32
    %c0_i32_1 = arith.constant 0 : i32
    return %c0_i32, %c0_i32_0 : i32, i32
  }
  func.func @transform_7(%arg0: i32) -> (i32, i32) {
    %c0_i32 = arith.constant 0 : i32
    %c0_i32_0 = arith.constant 0 : i32
    %c0_i32_1 = arith.constant 0 : i32
    return %c0_i32, %c0_i32_0 : i32, i32
  }
  func.func @transform_8(%arg0: i32) -> (i32, i32) {
    %c0_i32 = arith.constant 0 : i32
    %c0_i32_0 = arith.constant 0 : i32
    %c0_i32_1 = arith.constant 0 : i32
    return %c0_i32, %c0_i32_0 : i32, i32
  }
  func.func @transform_9(%arg0: i32) -> (i32, i32) {
    %c0_i32 = arith.constant 0 : i32
    %c0_i32_0 = arith.constant 0 : i32
    return %arg0, %c0_i32 : i32, i32
  }
}

</mosaic_0001>

<bundles_post_ra>
// kernel: tpu_custom_call.1
= control target key start
LH: loop header
LB: loop body
LE: loop exit
PB: predicated region body
PF: predicated region fallthrough
CT: control target
= control target key end

     0   :  { %v663_v2 = vmov 0   ;;  %s790_s0 = inlined_call_operand.vmem [shape: s32[16,6], index: 0, kind: input, shape index: {}]   ;;  %s791_s1 = inlined_call_operand.vmem [shape: f32[16,4], index: 1, kind: input, shape index: {}]   ;;  %s792_s2 = inlined_call_operand.vmem [shape: f32[30,32], index: 2, kind: input, shape index: {}]   ;;  %s793_s3 = inlined_call_operand.vmem [shape: f32[4,32], index: 3, kind: input, shape index: {}]   ;;  %s794_s4 = inlined_call_operand.vmem [shape: f32[1,32], index: 4, kind: input, shape index: {}]   ;;  %s795_s5 = inlined_call_operand.vmem [shape: f32[32,16], index: 5, kind: input, shape index: {}]   ;;  %s796_s6 = inlined_call_operand.vmem [shape: f32[1,16], index: 6, kind: input, shape index: {}]   ;;  %s797_s7 = inlined_call_operand.vmem [shape: f32[16,128], index: 7, kind: input, shape index: {}]   ;;  %s798_s8 = inlined_call_operand.vmem [shape: f32[1,128], index: 8, kind: input, shape index: {}]   ;;  %s799_s9 = inlined_call_operand.hbm [shape: f32[16,128], index: 9, kind: output, shape index: {}]  }
   0x1   :  { %v34_v0 = vld [vmem:[%s790_s0 + $0x8] sm:$0xff]  ;;  %v33_v1 = vld [vmem:[%s790_s0] sm:$0xff]  ;;  %630 = vset.pattern.permute.xlu1 %v663_v2  ;;  %628 = vset.pattern.permute.xlu0 %v663_v2 }
   0x2   :  { %14 = vsyncpa [#allocation3], 0  ;;  %41 = vperm.xlu1 %630, %v34_v0   ;;  %38 = vperm.xlu0 %628, %v33_v1   ;;  %v664_v3 = vmov 1   ;;  %v665_v4 = vmov 2   ;;  %v666_v5 = vmov 3   ;;  %v667_v6 = vmov 4  }
   0x3   :  { %v668_v7 = vmov 5   ;;  %v127_v8 = vld [vmem:[%s793_s3] sm:$0xf]  ;;  %vm135_vm0 = vcmask 1043456   ;;  %v122_v10 = vld [vmem:[%s792_s2 + $0x8] sm:$0xff]  ;;  %vm128_vm1 = vcmask 31744   ;;  %v35_v23 = vlaneseq }
   0x4   :  { %559 = vmatprep.subr.msk.mxu0 %vm135_vm0, %v127_v8  ;;  %v121_v9 = vld [vmem:[%s792_s2] sm:$0xff]  ;;  %v126_v13 = vld [vmem:[%s791_s1 + $0x8] sm:$0xff]  ;;  %v123_v14 = vld [vmem:[%s792_s2 + $0x10] sm:$0xff]  ;;  %vm221_vm2 = vcmask 1045504   ;;  %vm669_vm3 = vmmov 1   ;;  %v670_v29 = vmov 0.0  }
   0x5   :  { %560 = vmatpush3.msk.msra.mxu0 %vm135_vm0, %v127_v8  ;;  %v125_v11 = vld [vmem:[%s791_s1] sm:$0xff]  ;;  %v593_v12 = vpack.c.bf16 %v122_v10, %v121_v9  ;;  %v124_v15 = vld [vmem:[%s792_s2 + $0x18] sm:$0x3f]  ;;  %vm598_vm4 = vmpackc.low %vm221_vm2, %vm669_vm3  ;;  %v36_v26 = vand.u32 127, %v35_v23  ;;  %vm322_vm2 = vcmask 261120   ;;  %vm415_vm3 = vcmask 130048  }
   0x6   :  { %631 = vset.pattern.permute.xlu1 %v664_v3  ;;  %629 = vset.pattern.permute.xlu0 %v664_v3  ;;  %v597_v16 = vpack.c.bf16 %v124_v15, %v123_v14  ;;  %v311_v17 = vld [vmem:[%s795_s5] sm:$0xff]  ;;  %v312_v18 = vld [vmem:[%s795_s5 + $0x8] sm:$0xff]  ;;  %v313_v57 = vld [vmem:[%s795_s5 + $0x10] sm:$0xff] }
   0x7   :  { %55 = vperm.xlu1 %631, %v34_v0   ;;  %52 = vperm.xlu0 %629, %v33_v1   ;;  %v603_v19 = vpack.c.bf16 %v312_v18, %v311_v17  ;;  %v314_v58 = vld [vmem:[%s795_s5 + $0x18] sm:$0xff]  ;;  %v533_v60 = vld [vmem:[%s794_s4] ss:$0 sm:$0xff] }
   0x8   :  { %561 = vmatprep.mubr.msk.f32.mxu0 %vm128_vm1, %v125_v11  ;;  %594 = vmatprep.subr.bf16.mxu0 %v593_v12  ;;  %v607_v59 = vpack.c.bf16 %v314_v58, %v313_v57  ;;  %v406_v3 = vld [vmem:[%s797_s7] sm:$0xff] }
   0x9   :  { %562 = vmatmul.mubr.msk.f32.vlgmr.msra.gmra.mrb[0].mxu0 %vm128_vm1, %v126_v13  ;;  %604 = vmatprep.subr.bf16.mxu1 %v603_v19  ;;  %vm214_vm1 = vcmask 244736   ;;  %v537_v13 = vld [vmem:[%s798_s8] ss:$0 sm:$0xff] }
   0xa   :  { %596 = vmatpush3.bf16.msra.mxu0 %v593_v12  ;;  %606 = vmatpush3.bf16.msra.mxu1 %v603_v19 }
   0xb   :  { %632 = vset.pattern.permute.xlu1 %v665_v4  ;;  %633 = vset.pattern.permute.xlu0 %v665_v4  ;;  %v407_v4 = vld [vmem:[%s797_s7 + $0x8] sm:$0xff]  ;;  %s671_s7 = smov [#allocation2]  }
   0xc   :  { %66 = vperm.xlu1 %632, %v33_v1   ;;  %69 = vperm.xlu0 %633, %v34_v0   ;;  %s504_s17 = sshll.u32 %s671_s7, 4  ;;  %s505_s17 = int_to_ptr.vmem [resolvable:$true] %s504_s17 }
   0xd   :  { %599 = vmatprep.subr.msk.bf16.mxu0 %vm598_vm4, %v597_v16  ;;  %608 = vmatprep.subr.bf16.mxu1 %v607_v59  ;;  %p644_p1 = scmp.lt.s32.totalorder %s505_s17, %s505_s17 }
   0xe   :  { %602 = vmatpush3.bf16.msk.msra.mxu0 %vm598_vm4, %v597_v16  ;;  %610 = vmatpush3.bf16.msra.mxu1 %v607_v59 }
  0x10   :  { %634 = vset.pattern.permute.xlu1 %v666_v5  ;;  %635 = vset.pattern.permute.xlu0 %v667_v6  ;;  %v611_v5 = vpack.c.bf16 %v407_v4, %v406_v3 }
  0x11   :  { %80 = vperm.xlu1 %634, %v33_v1   ;;  %94 = vperm.xlu0 %635, %v33_v1  }
  0x12   :  { %612 = vmatprep.subr.bf16.mxu1 %v611_v5 }
  0x15   :  { %83 = vperm.xlu1 %634, %v34_v0   ;;  %638 = vset.pattern.permute.xlu0 %v668_v7 }
  0x16   :  { %111 = vperm.xlu0 %638, %v34_v0  }
  0x19   :  { %636 = vset.pattern.permute.xlu1 %v667_v6  ;;  %v534_v6 = vld [vmem:[%s796_s6] ss:$0 sm:$0xff]  ;;  %s639_s6 = scalar_lea.vmem %s505_s17, 256 }
  0x1a   :  { %97 = vperm.xlu1 %636, %v34_v0   ;;  %p640_p0 = scmp.ne.s32.totalorder %s505_s17, %s639_s6  ;;  %p645_p2 = scmp.lt.s32.totalorder %s639_s6, %s639_s6 }
  0x1c   :  { %p646_p3 = por %p645_p2, %p644_p1 }
  0x1e   :  { %637 = vset.pattern.permute.xlu1 %v668_v7  ;;  %p647_p4 = pnand %p646_p3, %p640_p0 }
  0x1f   :  { %108 = vperm.xlu1 %637, %v33_v1  }
  0x81   :  { %v42_v20 = vpop.permute.xlu1 %41  ;;  %v39_v21 = vpop.permute.xlu0 %38 }
  0x82   :  { %vm43_vm5 = vcmp.eq.s32.totalorder %v36_v26, %v39_v21  ;;  %vm44_vm9 = vcmp.eq.s32.totalorder %v36_v26, %v42_v20 }
  0x83   :  { %v515_v30 = vsel %vm43_vm5, 1.0, %v670_v29  ;;  %v516_v37 = vsel %vm44_vm9, 1.0, %v670_v29 }
  0x86   :  { %v56_v22 = vpop.permute.xlu1 %55  ;;  %v53_v24 = vpop.permute.xlu0 %52 }
  0x87   :  { %vm57_vm6 = vcmp.eq.s32.totalorder %v36_v26, %v53_v24  ;;  %vm58_vm7 = vcmp.eq.s32.totalorder %v36_v26, %v56_v22 }
  0x88   :  { %v517_v31 = vsel %vm57_vm6, 1.0, %v670_v29  ;;  %v518_v33 = vsel %vm58_vm7, 1.0, %v670_v29 }
  0x89   :  { %v63_v34 = vadd.f32 %v517_v31, %v515_v30  ;;  %v64_v39 = vadd.f32 %v518_v33, %v516_v37 }
  0x8b   :  { %v67_v25 = vpop.permute.xlu1 %66  ;;  %v70_v28 = vpop.permute.xlu0 %69 }
  0x8c   :  { %vm71_vm8 = vcmp.eq.s32.totalorder %v36_v26, %v67_v25  ;;  %vm72_vm10 = vcmp.eq.s32.totalorder %v36_v26, %v70_v28 }
  0x8d   :  { %v519_v36 = vsel %vm71_vm8, 1.0, %v670_v29  ;;  %v520_v38 = vsel %vm72_vm10, 1.0, %v670_v29 }
  0x8e   :  { %v77_v41 = vadd.f32 %v519_v36, %v63_v34  ;;  %v78_v45 = vadd.f32 %v520_v38, %v64_v39 }
  0x90   :  { %v81_v27 = vpop.permute.xlu1 %80  ;;  %v95_v35 = vpop.permute.xlu0 %94 }
  0x91   :  { %vm85_vm11 = vcmp.eq.s32.totalorder %v36_v26, %v81_v27  ;;  %vm99_vm13 = vcmp.eq.s32.totalorder %v36_v26, %v95_v35 }
  0x92   :  { %v521_v40 = vsel %vm85_vm11, 1.0, %v670_v29  ;;  %v523_v48 = vsel %vm99_vm13, 1.0, %v670_v29 }
  0x93   :  { %v91_v46 = vadd.f32 %v521_v40, %v77_v41 }
  0x94   :  { %v84_v32 = vpop.permute.xlu1 %83 }
  0x95   :  { %vm86_vm12 = vcmp.eq.s32.totalorder %v36_v26, %v84_v32  ;;  %v112_v44 = vpop.permute.xlu0 %111  ;;  %v105_v52 = vadd.f32 %v523_v48, %v91_v46 }
  0x96   :  { %v522_v42 = vsel %vm86_vm12, 1.0, %v670_v29  ;;  %vm114_vm15 = vcmp.eq.s32.totalorder %v36_v26, %v112_v44 }
  0x97   :  { %v92_v49 = vadd.f32 %v522_v42, %v78_v45  ;;  %v526_v53 = vsel %vm114_vm15, 1.0, %v670_v29 }
  0x99   :  { %v98_v43 = vpop.permute.xlu1 %97 }
  0x9a   :  { %vm100_vm14 = vcmp.eq.s32.totalorder %v36_v26, %v98_v43 }
  0x9b   :  { %v524_v47 = vsel %vm100_vm14, 1.0, %v670_v29 }
  0x9c   :  { %v106_v50 = vadd.f32 %v524_v47, %v92_v49 }
  0x9e   :  { %v109_v51 = vpop.permute.xlu1 %108  ;;  %v120_v56 = vadd.f32 %v526_v53, %v106_v50 }
  0x9f   :  { %vm113_vm0 = vcmp.eq.s32.totalorder %v36_v26, %v109_v51 }
  0xa0   :  { %v525_v54 = vsel %vm113_vm0, 1.0, %v670_v29 }
  0xa1   :  { %v119_v55 = vadd.f32 %v525_v54, %v105_v52 }
  0xa3   :  { %572 = vmatprep.mubr.msk.f32.mxu0 %vm214_vm1, %v119_v55 }
  0xa4   :  { %573 = vmatmul.mubr.msk.f32.vlgmr.msra.gmra.mrb[0].mxu0 %vm214_vm1, %v120_v56 }
 0x177   :  { %v574_v61 = vpop.f32.mrb[0].mxu0 }
 0x178   :  { %v308_v62 = vadd.f32 %v574_v61, %v533_v60  ;;  %v291_v63 = vpop.f32.mrb[1].mxu0 }
 0x179   :  { %v307_v0 = vadd.f32 %v533_v60, %v291_v63 }
 0x17a   :  { %v310_v2 = vmax.f32 %v308_v62, 0.0 }
 0x17b   :  { %v309_v1 = vmax.f32 %v307_v0, 0.0 }
 0x17d   :  { %583 = vmatprep.mubr.msk.f32.mxu1 %vm322_vm2, %v309_v1 }
 0x17e   :  { %584 = vmatmul.mubr.msk.f32.vlgmr.msra.gmra.mrb[0].mxu1 %vm322_vm2, %v310_v2 }
 0x17f   :  { %614 = vmatpush3.bf16.msra.mxu1 %v611_v5 }
 0x251   :  { %v585_v7 = vpop.f32.mrb[0].mxu1 }
 0x252   :  { %v401_v8 = vadd.f32 %v585_v7, %v534_v6  ;;  %v395_v9 = vpop.f32.mrb[1].mxu1 }
 0x253   :  { %v396_v10 = vadd.f32 %v534_v6, %v395_v9 }
 0x254   :  { %v405_v12 = vmax.f32 %v401_v8, 0.0 }
 0x255   :  { %v404_v11 = vmax.f32 %v396_v10, 0.0 }
 0x257   :  { %590 = vmatprep.mubr.msk.f32.mxu1 %vm415_vm3, %v404_v11 }
 0x258   :  { %591 = vmatmul.mubr.msk.f32.vlgmr.msra.gmra.mrb[2].mxu1 %vm415_vm3, %v405_v12 }
 0x32b   :  { %v592_v14 = vpop.f32.mrb[2].mxu1 }
 0x32c   :  { %v494_v15 = vadd.f32 %v592_v14, %v537_v13  ;;  %v488_v16 = vpop.f32.mrb[3].mxu1 }
 0x32d   :  { %v489_v17 = vadd.f32 %v537_v13, %v488_v16 }
 0x32e   :  { %498 = vst [vmem:[#allocation2 + $0x8] sm:$0xff] %v494_v15 }
 0x32f   :  { %497 = vst [vmem:[#allocation2] sm:$0xff] %v489_v17 }
 0x330   :  { %650 = shalt.err (!%p647_p4)
}
 0x331   :  { %s651_s8 = scalar_lea.hbm %s799_s9, 256 }
 0x332   :  { %p652_p5 = scmp.ne.s32.totalorder %s799_s9, %s651_s8  ;;  %p655_p6 = scmp.lt.u32.totalorder %s651_s8, %s799_s9 }
 0x334   :  { %p657_p7 = pnand %p655_p6, %p652_p5 }
 0x336   :  { %660 = shalt.err (!%p657_p7)
}
 0x337   :  { %s672_s23 = smov 128   ;;  %s673_s24 = smov 8  }
 0x338   :  { %510 = dma.vmem_to_hbm [thread:$0]  %s505_s17, 256, %s799_s9, [#allocation3], %s672_s23, %s672_s23, %s673_s24  }
 0x339   :  { %661 = dma.done.wait [#allocation3], 256  }
 0x33a   :  { %662 = vsyncadd [#allocation3], 4294967040 }
 0x33b   :  { %514 = vsyncpa [#allocation3], 1 }

</bundles_post_ra>
